<compile_context>
chip_gen: v5e
topology: v5e:2x2
jax: 0.10.0
libtpu: 0.0.40
codegen_flags: <defaults>
</compile_context>

<pallas_src>
import functools

import jax
import jax.numpy as jnp
from jax import lax
from jax.experimental import pallas as pl
from jax.experimental.pallas import tpu as pltpu


_LANE = 512          # last-dim tile width (multiple of 128 -> lane dense)
_ROW_ALIGN = 32      # row-block multiple (covers int8 (32,128) tiling too)
_PAD_LOGIT = -30.0   # sentinel: with target=0 its loss contribution is exactly 0


def _pow_static(x, g):
    """x**g with a static exponent; integer g -> lax.integer_pow (VPU only)."""
    if isinstance(g, int):
        return x if g == 1 else lax.integer_pow(x, g)
    return x ** g


def _num_tensorcores():
    """Best-effort TensorCores-per-chip (v7x=2, v5e/v6e=1).

    Only used to size the leading 'parallel' partial-sum axis; falling back to
    1 is always correct (just leaves the second v7x core idle for this kernel).
    """
    try:
        info = pltpu.get_tpu_info()
    except Exception:
        return 1
    for name in ("num_cores", "core_count", "num_tensorcores",
                 "tensorcore_count", "num_cores_per_chip"):
        v = getattr(info, name, None)
        if v is None:
            continue
        try:
            v = int(v)
        except (TypeError, ValueError):
            continue
        if v >= 1:
            return min(v, 2)
    return 1


def _loss_kernel(x_ref, t_ref, o_ref, acc_ref, *, gamma_pos, gamma_neg, clip,
                 eps, pos_weight, fast_sigmoid, rows_per_tile, acc_rows, lane):
    s = pl.program_id(1)   # "arbitrary" serial step within this parallel part

    @pl.when(s == 0)
    def _init():
        acc_ref[...] = jnp.zeros_like(acc_ref)

    x = x_ref[...].astype(jnp.float32)
    t = t_ref[...].astype(jnp.float32)

    if fast_sigmoid:
        # v7x knob (EUP-bound regime): exp + approx reciprocal instead of the
        # exact sigmoid; clamp to 1 so the negative probability stays >= 0.
        p = jnp.minimum(pl.reciprocal(1.0 + jnp.exp(-x), approx=True), 1.0)
    else:
        p = jax.nn.sigmoid(x)
    p_neg = 1.0 - p
    if clip is not None and clip > 0:
        p_neg = jnp.minimum(p_neg + clip, 1.0)   # shift only the negative prob

    # One log per element (hard {0,1} targets): select the per-class prob.
    is_pos = t > 0.5
    p_sel = jnp.where(is_pos, p, p_neg)
    logp = jnp.log(jnp.maximum(p_sel, eps))       # eps clamp INSIDE the log

    # BCEWithLogitsLoss-style scalar pos_weight on the positive branch.
    if pos_weight is not None and float(pos_weight) != 1.0:
        logp = logp * jnp.where(is_pos, float(pos_weight), 1.0)

    # Asymmetric focal weight (1 - pt)^gamma with per-side static gammas.
    if gamma_pos == 0 and gamma_neg == 0:
        ll = logp
    else:
        base = 1.0 - p_sel
        if gamma_pos == 0:
            w = jnp.where(is_pos, 1.0, _pow_static(base, gamma_neg))
        elif gamma_neg == 0:
            w = jnp.where(is_pos, _pow_static(base, gamma_pos), 1.0)
        else:
            w = jnp.where(is_pos, _pow_static(base, gamma_pos),
                          _pow_static(base, gamma_neg))
        ll = logp * w

    # Reduce the tile to an (acc_rows, lane) partial in-register (VPU adds over
    # sublane slabs) before the accumulate store: cuts vst traffic & scratch.
    if rows_per_tile != acc_rows:
        ll = jnp.sum(ll.reshape(rows_per_tile // acc_rows, acc_rows, lane),
                     axis=0)
    acc_ref[...] += ll

    @pl.when(s == pl.num_programs(1) - 1)
    def _finalize():
        # Single cross-lane/sublane reduction per part, in the epilogue.
        o_ref[0, 0] = -jnp.sum(acc_ref[...])


def asymmetric_multilabel_loss(logits, targets, *, gamma_pos=0, gamma_neg=4,
                               clip=0.05, eps=1e-8, pos_weight=None,
                               reduction="mean", row_block=None, num_parts=None,
                               fast_sigmoid=False):
    """Pallas TPU multi-label loss (asymmetric focal / BCE-with-logits family).

    logits, targets: same shape (any rank; flattened internally). Targets must
    be hard {0,1} labels (int8/bf16/f32 all fine -- narrow dtypes shrink HBM).
    Returns a scalar f32 ('mean' over real elements or 'sum').
    """
    assert logits.shape == targets.shape, (logits.shape, targets.shape)
    n = int(logits.size)
    assert n > 0

    # Keep integral gammas as Python ints -> lax.integer_pow, never float pow.
    if float(gamma_pos) == int(gamma_pos):
        gamma_pos = int(gamma_pos)
    if float(gamma_neg) == int(gamma_neg):
        gamma_neg = int(gamma_neg)

    lane = _LANE
    rows = -(-n // lane)                       # rows of the lane-dense view

    nparts = _num_tensorcores() if num_parts is None else max(1, int(num_parts))

    # Row block: default 512 rows (~1 MiB of f32 logits = 256K elem per tile);
    # multiple of 32 unless a single block covers every row.
    rb = 512 if row_block is None else int(row_block)
    if rb >= rows or rows <= _ROW_ALIGN:
        rb = rows
        nparts = 1
    else:
        rb = max(_ROW_ALIGN, (min(rb, rows) // _ROW_ALIGN) * _ROW_ALIGN)

    nblk = -(-rows // rb)
    if nparts > 1 and nblk < nparts:
        # Shrink the row block so every TensorCore gets at least one block.
        cand = ((rows // nparts) // _ROW_ALIGN) * _ROW_ALIGN
        if cand >= _ROW_ALIGN:
            rb = cand
            nblk = -(-rows // rb)
        if nblk < nparts:
            nparts = 1
    spp = -(-nblk // nparts)                   # serial steps per parallel part
    # Pad to FULL grid coverage: no index clamping / per-element masking in the
    # kernel; padded elements use a sentinel whose loss is exactly 0.0.
    rows_padded = nparts * spp * rb

    acc_rows = 8 if rb % 8 == 0 else rb

    # Flatten to the lane-dense (rows_padded, lane) view (layout plumbing only).
    pad = rows_padded * lane - n
    flat_x = logits.reshape(-1)
    flat_t = targets.reshape(-1)
    if pad:
        flat_x = jnp.pad(flat_x, (0, pad), constant_values=_PAD_LOGIT)
        flat_t = jnp.pad(flat_t, (0, pad), constant_values=0)
    x2 = flat_x.reshape(rows_padded, lane)
    t2 = flat_t.reshape(rows_padded, lane)

    # VMEM budget: 2 inputs x 2 pipeline buffers + (acc_rows, lane) f32 acc,
    # with headroom; keep <= 48 MiB so v7x (64 MiB physical) is always safe.
    tile_bytes = rb * lane * (x2.dtype.itemsize + t2.dtype.itemsize)
    acc_bytes = acc_rows * lane * 4
    vmem_limit = int(min(48 << 20,
                         max(16 << 20, 4 * tile_bytes + acc_bytes + (4 << 20))))

    kernel = functools.partial(
        _loss_kernel, gamma_pos=gamma_pos, gamma_neg=gamma_neg, clip=clip,
        eps=eps, pos_weight=pos_weight, fast_sigmoid=fast_sigmoid,
        rows_per_tile=rb, acc_rows=acc_rows, lane=lane)

    in_map = lambda c, s: (c * spp + s, 0)

    partials = pl.pallas_call(
        kernel,
        out_shape=jax.ShapeDtypeStruct((nparts, 1), jnp.float32),
        grid_spec=pltpu.PrefetchScalarGridSpec(
            num_scalar_prefetch=0,
            grid=(nparts, spp),
            in_specs=[pl.BlockSpec((rb, lane), in_map),
                      pl.BlockSpec((rb, lane), in_map)],
            out_specs=pl.BlockSpec((1, 1), lambda c, s: (c, 0),
                                   memory_space=pltpu.SMEM),
            scratch_shapes=[pltpu.VMEM((acc_rows, lane), jnp.float32)]),
        compiler_params=pltpu.CompilerParams(
            dimension_semantics=("parallel", "arbitrary"),
            vmem_limit_bytes=vmem_limit),
    )(x2, t2)

    total = jnp.sum(partials)
    if reduction == "mean":
        return total / n        # mean over REAL elements, not padded ones
    return total


def bce_with_logits_loss(logits, targets, *, pos_weight=None, reduction="mean",
                         **kwargs):
    """nn.BCEWithLogitsLoss(pos_weight=w) equivalent for hard {0,1} targets
    (the module's loss_fn uses a uniform per-class pos_weight of 3.0)."""
    return asymmetric_multilabel_loss(
        logits, targets, gamma_pos=0, gamma_neg=0, clip=0.0, eps=1e-12,
        pos_weight=pos_weight, reduction=reduction, **kwargs)


def multi_classification_compute_loss(main_logits, aux_logits, targets, *,
                                      pos_weight=3.0):
    """Mirrors MultiClassificationTorch.compute_loss: BCEWithLogits(pos_weight)
    on the main head plus 0.1 * the same loss per auxiliary head."""
    loss = bce_with_logits_loss(main_logits, targets, pos_weight=pos_weight)
    for aux in aux_logits:
        loss = loss + 0.1 * bce_with_logits_loss(aux, targets,
                                                 pos_weight=pos_weight)
    return loss


# ----------------------------- pure-JAX references --------------------------

def multilabel_loss_ref(logits, targets, *, gamma_pos=0, gamma_neg=4, clip=0.05,
                        eps=1e-8, pos_weight=None, reduction="mean"):
    """Canonical AsymmetricLoss math (t / (1-t) weighted), optional pos_weight."""
    x = logits.astype(jnp.float32)
    t = targets.astype(jnp.float32)
    xs_pos = jax.nn.sigmoid(x)
    xs_neg = 1.0 - xs_pos
    if clip is not None and clip > 0:
        xs_neg = jnp.minimum(xs_neg + clip, 1.0)
    pw = 1.0 if pos_weight is None else float(pos_weight)
    los_pos = pw * t * jnp.log(jnp.maximum(xs_pos, eps))
    los_neg = (1.0 - t) * jnp.log(jnp.maximum(xs_neg, eps))
    loss = los_pos + los_neg
    if gamma_pos > 0 or gamma_neg > 0:
        pt = xs_pos * t + xs_neg * (1.0 - t)
        gamma = gamma_pos * t + gamma_neg * (1.0 - t)
        loss = loss * (1.0 - pt) ** gamma
    loss = -loss
    return jnp.mean(loss) if reduction == "mean" else jnp.sum(loss)


def bce_with_logits_ref(logits, targets, *, pos_weight=1.0, reduction="mean"):
    """Numerically stable nn.BCEWithLogitsLoss(pos_weight) reference."""
    x = logits.astype(jnp.float32)
    t = targets.astype(jnp.float32)
    loss = -(float(pos_weight) * t * jax.nn.log_sigmoid(x)
             + (1.0 - t) * jax.nn.log_sigmoid(-x))
    return jnp.mean(loss) if reduction == "mean" else jnp.sum(loss)


if __name__ == "__main__":
    key = jax.random.PRNGKey(0)
    k1, k2, k3, k4, k5 = jax.random.split(key, 5)

    # num_classes=8 as in MultiClassificationTorch; int8 hard labels.
    B, C = 52, 8
    logits = jax.random.normal(k1, (B, C), dtype=jnp.float32) * 3.0
    targets = (jax.random.uniform(k2, (B, C)) > 0.7).astype(jnp.int8)
    aux_logits = jax.random.normal(k5, (B, C), dtype=jnp.float32) * 3.0

    def _check(got, ref, rtol, atol, tag):
        got = jax.block_until_ready(got)
        ref = jax.block_until_ready(ref)
        assert bool(jnp.isfinite(got)), (tag, "non-finite", got)
        assert jnp.allclose(got, ref, rtol=rtol, atol=atol), (tag, got, ref)

    # 1) The module's actual loss_fn: BCEWithLogitsLoss(pos_weight=3.0), mean.
    _check(bce_with_logits_loss(logits, targets, pos_weight=3.0),
           bce_with_logits_ref(logits, targets, pos_weight=3.0),
           1e-4, 1e-5, "bce_main")

    # 2) compute_loss(): main head + 0.1 * auxiliary head, as in the module.
    _check(multi_classification_compute_loss(logits, [aux_logits], targets),
           bce_with_logits_ref(logits, targets, pos_weight=3.0)
           + 0.1 * bce_with_logits_ref(aux_logits, targets, pos_weight=3.0),
           1e-4, 1e-5, "compute_loss")

    # 3) Asymmetric-focal variant (gamma_neg=4, clip=0.05), small single tile.
    _check(asymmetric_multilabel_loss(logits, targets),
           multilabel_loss_ref(logits, targets),
           5e-5, 1e-6, "asl_small")

    # 4) Larger lane-dense tiled path with 2 parallel partial sums, bf16 logits
    #    + int8 targets, ragged tail exercising the sentinel padding.
    B2 = 4000
    logits2 = (jax.random.normal(k3, (B2, C), dtype=jnp.float32) * 2.5
               ).astype(jnp.bfloat16)
    targets2 = (jax.random.uniform(k4, (B2, C)) > 0.7).astype(jnp.int8)
    _check(asymmetric_multilabel_loss(logits2, targets2, row_block=32,
                                      num_parts=2),
           multilabel_loss_ref(logits2, targets2),
           1e-4, 1e-5, "asl_big_tiled")

    # 5) v7x EUP knob (approx sigmoid) -- looser tolerance by construction.
    _check(asymmetric_multilabel_loss(logits, targets, fast_sigmoid=True),
           multilabel_loss_ref(logits, targets),
           3e-2, 5e-3, "asl_fast_sigmoid")

    print("KERNEL_OK")
</pallas_src>

<mosaic_0001>
module attributes {stable_mosaic.version = 11 : i64} {
  func.func @_loss_kernel(%arg0: i32, %arg1: i32, %arg2: memref<1x512xf32, #tpu.memory_space<vmem>>, %arg3: memref<1x512xi8, #tpu.memory_space<vmem>>, %arg4: memref<1x1xf32, #tpu.memory_space<smem>>, %arg5: memref<1x512xf32, #tpu.memory_space<vmem>>) attributes {dimension_semantics = [#tpu.dimension_semantics<parallel>, #tpu.dimension_semantics<arbitrary>], iteration_bounds = array<i64: 1, 1>, scalar_prefetch = 0 : i64, scratch_operands = 1 : i64, tpu.core_type = #tpu.core_type<tc>, window_params = [{transform_indices = @transform_0, window_bounds = array<i64: 1, 512>}, {transform_indices = @transform_1, window_bounds = array<i64: 1, 512>}, {transform_indices = @transform_2, window_bounds = array<i64: 1, 1>}]} {
    %c0_i32 = arith.constant 0 : i32
    %0 = arith.cmpi eq, %arg1, %c0_i32 : i32
    %1 = arith.extui %0 : i1 to i32
    %c0_i32_0 = arith.constant 0 : i32
    %2 = arith.cmpi ne, %1, %c0_i32_0 : i32
    scf.if %2 {
      %cst_15 = arith.constant 0.000000e+00 : f32
      %29 = vector.broadcast %cst_15 : f32 to vector<1x512xf32>
      %c0_16 = arith.constant 0 : index
      %c0_17 = arith.constant 0 : index
      %30 = vector.load %arg5[%c0_16, %c0_17] : memref<1x512xf32, #tpu.memory_space<vmem>>, vector<1x512xf32>
      tpu.vector_store %arg5[%c0_16, %c0_17], %29 {strides = array<i32>} : memref<1x512xf32, #tpu.memory_space<vmem>>, vector<1x512xf32>,
    } else {
    }
    %c0 = arith.constant 0 : index
    %c0_1 = arith.constant 0 : index
    %3 = vector.load %arg2[%c0, %c0_1] : memref<1x512xf32, #tpu.memory_space<vmem>>, vector<1x512xf32>
    %c0_2 = arith.constant 0 : index
    %c0_3 = arith.constant 0 : index
    %4 = vector.load %arg3[%c0_2, %c0_3] : memref<1x512xi8, #tpu.memory_space<vmem>>, vector<1x512xi8>
    %5 = arith.sitofp %4 : vector<1x512xi8> to vector<1x512xf32>
    %6 = arith.negf %3 : vector<1x512xf32>
    %7 = math.exp %6 : vector<1x512xf32>
    %cst = arith.constant 1.000000e+00 : f32
    %8 = vector.broadcast %cst : f32 to vector<1x512xf32>
    %9 = arith.addf %8, %7 : vector<1x512xf32>
    %10 = arith.divf %8, %9 : vector<1x512xf32>
    %cst_4 = arith.constant 1.000000e+00 : f32
    %11 = vector.broadcast %cst_4 : f32 to vector<1x512xf32>
    %12 = arith.subf %11, %10 : vector<1x512xf32>
    %cst_5 = arith.constant 5.000000e-01 : f32
    %13 = vector.broadcast %cst_5 : f32 to vector<1x512xf32>
    %14 = arith.cmpf ogt, %5, %13 : vector<1x512xf32>
    %15 = arith.select %14, %10, %12 : vector<1x512xi1>, vector<1x512xf32>
    %cst_6 = arith.constant 9.99999996E-13 : f32
    %16 = vector.broadcast %cst_6 : f32 to vector<1x512xf32>
    %17 = arith.maximumf %15, %16 : vector<1x512xf32>
    %18 = math.log %17 : vector<1x512xf32>
    %cst_7 = arith.constant 3.000000e+00 : f32
    %cst_8 = arith.constant 1.000000e+00 : f32
    %19 = vector.broadcast %cst_7 : f32 to vector<1x512xf32>
    %20 = vector.broadcast %cst_8 : f32 to vector<1x512xf32>
    %21 = arith.select %14, %19, %20 : vector<1x512xi1>, vector<1x512xf32>
    %22 = arith.mulf %18, %21 : vector<1x512xf32>
    %c0_9 = arith.constant 0 : index
    %c0_10 = arith.constant 0 : index
    %23 = vector.load %arg5[%c0_9, %c0_10] : memref<1x512xf32, #tpu.memory_space<vmem>>, vector<1x512xf32>
    %24 = arith.addf %23, %22 : vector<1x512xf32>
    %c0_11 = arith.constant 0 : index
    %c0_12 = arith.constant 0 : index
    %25 = vector.load %arg5[%c0_11, %c0_12] : memref<1x512xf32, #tpu.memory_space<vmem>>, vector<1x512xf32>
    tpu.vector_store %arg5[%c0_11, %c0_12], %24 {strides = array<i32>} : memref<1x512xf32, #tpu.memory_space<vmem>>, vector<1x512xf32>,
    %c0_i32_13 = arith.constant 0 : i32
    %26 = arith.cmpi eq, %arg1, %c0_i32_13 : i32
    %27 = arith.extui %26 : i1 to i32
    %c0_i32_14 = arith.constant 0 : i32
    %28 = arith.cmpi ne, %27, %c0_i32_14 : i32
    scf.if %28 {
      %c0_15 = arith.constant 0 : index
      %c0_16 = arith.constant 0 : index
      %29 = vector.load %arg5[%c0_15, %c0_16] : memref<1x512xf32, #tpu.memory_space<vmem>>, vector<1x512xf32>
      %30 = vector.shape_cast %29 : vector<1x512xf32> to vector<1x1x512xf32>
      %cst_17 = arith.constant dense<0.000000e+00> : vector<1xf32>
      %31 = vector.multi_reduction <add>, %30, %cst_17 [1, 2] : vector<1x1x512xf32> to vector<1xf32>
      %32 = vector.shape_cast %31 : vector<1xf32> to vector<1x1x1xf32>
      %33 = vector.extract %32[0, 0, 0] : f32 from vector<1x1x1xf32>
      %cst_18 = arith.constant 0.000000e+00 : f32
      %34 = arith.subf %cst_18, %33 : f32
      %c0_19 = arith.constant 0 : index
      %c0_20 = arith.constant 0 : index
      %35 = memref.load %arg4[%c0_19, %c0_20] : memref<1x1xf32, #tpu.memory_space<smem>>
      memref.store %34, %arg4[%c0_19, %c0_20] : memref<1x1xf32, #tpu.memory_space<smem>>
    } else {
    }
    return
  }
  func.func @transform_0(%arg0: i32, %arg1: i32) -> (i32, i32) {
    %c1_i32 = arith.constant 1 : i32
    %0 = arith.muli %arg0, %c1_i32 : i32
    %1 = arith.addi %0, %arg1 : i32
    %c0_i32 = arith.constant 0 : i32
    %c0_i32_0 = arith.constant 0 : i32
    return %1, %c0_i32 : i32, i32
  }
  func.func @transform_1(%arg0: i32, %arg1: i32) -> (i32, i32) {
    %c1_i32 = arith.constant 1 : i32
    %0 = arith.muli %arg0, %c1_i32 : i32
    %1 = arith.addi %0, %arg1 : i32
    %c0_i32 = arith.constant 0 : i32
    %c0_i32_0 = arith.constant 0 : i32
    return %1, %c0_i32 : i32, i32
  }
  func.func @transform_2(%arg0: i32, %arg1: i32) -> (i32, i32) {
    %c0_i32 = arith.constant 0 : i32
    %c0_i32_0 = arith.constant 0 : i32
    return %arg0, %c0_i32 : i32, i32
  }
}

</mosaic_0001>

<bundles_post_ra>
// kernel: tpu_custom_call.1
= control target key start
LH: loop header
LB: loop body
LE: loop exit
PB: predicated region body
PF: predicated region fallthrough
CT: control target
= control target key end

     0   :  { %7 = vsyncpa [#allocation4], 0  ;;  %s315_s0 = inlined_call_operand.hbm [shape: f32[1,512], index: 0, kind: input, shape index: {}]   ;;  %s316_s1 = inlined_call_operand.hbm [shape: s8[1,512], index: 1, kind: input, shape index: {}]   ;;  %s317_s2 = inlined_call_operand.hbm [shape: f32[1,1], index: 2, kind: output, shape index: {}]  }
   0x1   :  { %8 = vsyncpa [#allocation7], 0 }
   0x2   :  { %9 = vsyncpa [#allocation5], 0  ;;  %s18_s11 = sshll.u32 %s315_s0, 4  ;;  %s271_s12 = smov [#allocation3]   ;;  %s19_s11 = int_to_ptr.hbm [resolvable:$true] %s18_s11 }
   0x3   :  { %s20_s13 = sshll.u32 %s271_s12, 4  ;;  %s32_s16 = sshll.u32 %s316_s1, 4  ;;  %s21_s13 = int_to_ptr.vmem [resolvable:$true] %s20_s13  ;;  %s33_s16 = int_to_ptr.hbm [resolvable:$true] %s32_s16 }
   0x4   :  { %23 = dma.hbm_to_vmem [thread:$0]  %s19_s11, 64, %s21_s13, [#allocation4]  }
   0x5   :  { %s272_s17 = smov [#allocation6]  }
   0x6   :  { %s34_s18 = sshll.u32 %s272_s17, 4  ;;  %s35_s18 = int_to_ptr.vmem [resolvable:$true] %s34_s18 }
   0x7   :  { %37 = dma.hbm_to_vmem [thread:$0]  %s33_s16, 64, %s35_s18, [#allocation7]  }
   0x8   :  { %265 = dma.done.wait [#allocation4], 64  }
   0x9   :  { %266 = vsyncadd [#allocation4], 4294967232 }
   0xa   :  { %267 = dma.done.wait [#allocation7], 64  }
   0xb   :  { %268 = vsyncadd [#allocation7], 4294967232  ;;  %v52_v0 = vlaneseq  ;;  %v273_v2 = vmov 0.0   ;;  %v57_v3 = vld [vmem:[#allocation3] sm:$0xf]  ;;  %v274_v11 = vmov 286326784  }
   0xc   :  { %v187_v4 = vmul.f32 -1.442695, %v57_v3  ;;  %v58_v8 = vld [vmem:[#allocation6] sm:$0xf]  ;;  %v87_v12 = vunpack.c.l.s4 %v274_v11  ;;  %v275_v13 = vmov 858989090  }
   0xd   :  { %vm299_vm0 = vcmp.lt.s32.totalorder %v52_v0, 512  ;;  %v91_v14 = vunpack.c.l.s4 %v275_v13  ;;  %v59_v17 = vunpack.c.0.s8 %v58_v8  ;;  %v60_v18 = vunpack.c.1.s8 %v58_v8  ;;  %s175_s19 = sshll.u32 %s317_s2, 4  ;;  %s277_s22 = smov [#allocation8]   ;;  %s176_s19 = int_to_ptr.hbm [resolvable:$true] %s175_s19 }
   0xe   :  { %56 = vst.msk [vmem:[#allocation2] sm:$0xf] %vm299_vm0, %v273_v2  ;;  %197 = vpow2.f32 %v187_v4  ;;  %v88_v22 = vunpack.c.0.s8 %v87_v12  ;;  %v276_v38 = vmov 1.0   ;;  %vm125_vm7 = vcmask 1040384  }
   0xf   :  { %v92_v23 = vunpack.c.0.s8 %v91_v14  ;;  %v61_v24 = vcvt.s32.f32 %v59_v17  ;;  %v62_v25 = vcvt.s32.f32 %v60_v18  ;;  %vm127_vm8 = vcmask 1042434  }
  0x10   :  { %vm129_vm9 = vcmask 1041408  }
  0x11   :  { %vm83_vm5 = vcmp.gt.f32.partialorder %v61_v24, 0.5  ;;  %vm84_vm6 = vcmp.gt.f32.partialorder %v62_v25, 0.5 }
  0x12   :  { %v115_v39 = vsel %vm83_vm5, 3.0, %v276_v38  ;;  %v116_v42 = vsel %vm84_vm6, 3.0, %v276_v38 }
  0x14   :  { %v198_v5 = vpop.eup %197 }
  0x15   :  { %v66_v6 = vadd.f32 1.0, %v198_v5  ;;  %v119_v49 = vld [vmem:[#allocation2] sm:$0xf] }
  0x17   :  { %199 = vrcp.f32 %v66_v6  ;;  %v78_v10 = vand.u32 2147483648, %v66_v6  ;;  %vm72_vm1 = vweird.f32 %v66_v6  ;;  %v76_v16 = vand.u32 2147483647, %v66_v6 }
  0x19   :  { %v79_v20 = vor.u32 1.1754944e-38, %v78_v10  ;;  %vm77_vm4 = vcmp.eq.f32.partialorder %v76_v16, 8.507059e+37 }
  0x1d   :  { %v200_v7 = vpop.eup %199 }
  0x1e   :  { %v68_v9 = vmul.f32 %v200_v7, %v66_v6  ;;  %vm73_vm2 = vweird.f32 %v200_v7 }
  0x1f   :  { %vm74_vm3 = vmor %vm72_vm1, %vm73_vm2 }
  0x20   :  { %v69_v15 = vsub.f32 1.0, %v68_v9 }
  0x22   :  { %v70_v19 = vmul.f32 %v200_v7, %v69_v15 }
  0x24   :  { %v71_v21 = vadd.f32 %v200_v7, %v70_v19 }
  0x26   :  { %v75_v26 = vsel %vm74_vm3, %v200_v7, %v71_v21 }
  0x27   :  { %v80_v27 = vsel %vm77_vm4, %v79_v20, %v75_v26 }
  0x28   :  { %v82_v28 = vsub.f32 1.0, %v80_v27  ;;  %v89_v29 = vperm.slane %v80_v27, %v88_v22  ;;  %v93_v30 = vperm.slane %v80_v27, %v92_v23 }
  0x2a   :  { %v100_v31 = vperm.slane %v82_v28, %v88_v22  ;;  %v104_v32 = vperm.slane %v82_v28, %v92_v23 }
  0x2c   :  { %v107_v33 = vsel %vm83_vm5, %v89_v29, %v100_v31  ;;  %v108_v34 = vsel %vm84_vm6, %v93_v30, %v104_v32 }
  0x2d   :  { %v109_v35 = vmax.f32 %v107_v33, 1e-12  ;;  %v110_v36 = vmax.f32 %v108_v34, 1e-12 }
  0x2f   :  { %201 = vlog2.f32 %v109_v35 }
  0x30   :  { %203 = vlog2.f32 %v110_v36 }
  0x35   :  { %v202_v37 = vpop.eup %201 }
  0x36   :  { %v204_v40 = vpop.eup %203  ;;  %v112_v41 = vmul.f32 0.6931472, %v202_v37 }
  0x37   :  { %v114_v43 = vmul.f32 0.6931472, %v204_v40 }
  0x38   :  { %v117_v44 = vmul.f32 %v115_v39, %v112_v41 }
  0x39   :  { %v118_v45 = vmul.f32 %v116_v42, %v114_v43 }
  0x3a   :  { %v122_v46 = vrot.slane %v117_v44, 3 }
  0x3b   :  { %v123_v47 = vrot.slane %v118_v45, 6  ;;  %v124_v48 = vrot.slane %v118_v45, 1 }
  0x3c   :  { %v126_v50 = vsel %vm125_vm7, %v117_v44, %v122_v46 }
  0x3d   :  { %v128_v51 = vsel %vm127_vm8, %v123_v47, %v124_v48 }
  0x3e   :  { %v130_v52 = vsel %vm129_vm9, %v126_v50, %v128_v51 }
  0x3f   :  { %v132_v53 = vadd.f32 %v130_v52, %v119_v49 }
  0x41   :  { %137 = vst.msk [vmem:[#allocation2] sm:$0xf] %vm299_vm0, %v132_v53 }
  0x48   :  { %v141_v54 = vld [vmem:[#allocation2] sm:$0xf] }
  0x49   :  { %v143_v55 = vperm.slane %v141_v54, 0  ;;  %v144_v56 = vperm.slane %v141_v54, 1  ;;  %v145_v57 = vperm.slane %v141_v54, 2  ;;  %v146_v58 = vperm.slane %v141_v54, 3 }
  0x4b   :  { %v151_v59 = vsel %vm125_vm7, %v143_v55, 0.0  ;;  %v152_v60 = vsel %vm125_vm7, %v144_v56, 0.0  ;;  %v154_v61 = vsel %vm125_vm7, %v145_v57, 0.0  ;;  %v156_v63 = vsel %vm125_vm7, %v146_v58, 0.0 }
  0x4c   :  { %v153_v62 = vadd.f32 %v152_v60, %v151_v59 }
  0x4e   :  { %v155_v0 = vadd.f32 %v154_v61, %v153_v62 }
  0x50   :  { %v157_v2 = vadd.f32 %v156_v63, %v155_v0 }
  0x52   :  { %158 = vadd.xlane.f32.xlu0 %v157_v2 }
  0xc5   :  { %v159_v3 = vpop.xlane.xlu0 %158 }
  0xc6   :  { %v160_v1 = vrot.slane %v159_v3, 4 }
  0xc8   :  { %v161_v4 = vadd.f32 %v160_v1, %v159_v3 }
  0xca   :  { %v162_v5 = vrot.slane %v161_v4, 2 }
  0xcc   :  { %v163_v6 = vadd.f32 %v162_v5, %v161_v4 }
  0xce   :  { %v164_v7 = vrot.slane %v163_v6, 1 }
  0xd0   :  { %v165_v8 = vadd.f32 %v164_v7, %v163_v6 }
  0xd2   :  { %188 = vpush %v165_v8 }
 0x103   :  { %s189_s20 = spop %188 }
 0x104   :  { %s167_s21 = ssub.f32 0.0, %s189_s20 }
 0x106   :  { %169 = sst [smem:[#allocation8]] %s167_s21 }
 0x107   :  { %178 = dma.smem_to_hbm %s277_s22, 16, %s176_s19, [#allocation5]  }
 0x108   :  { %269 = dma.done.wait [#allocation5], 16  }
 0x109   :  { %270 = vsyncadd [#allocation5], 4294967280 }
 0x10a   :  { %183 = sfence }
 0x10b   :  { %184 = vsyncpa [#allocation4], 1 }
 0x10c   :  { %185 = vsyncpa [#allocation7], 1 }
 0x10d   :  { %186 = vsyncpa [#allocation5], 1 }

</bundles_post_ra>
